<compile_context>
chip_gen: v7x
topology: tpu7x:2x2x1
jax: 0.10.0
libtpu: 0.0.40
codegen_flags: <defaults>
</compile_context>

<pallas_src>
import jax
import jax.numpy as jnp
from jax.experimental import pallas as pl
from jax.experimental.pallas import tpu as pltpu


def fire_forward(x, wsq, bsq, we1, be1, we3, be3):
    """Fire forward on NCHW input. Conv weights are in PyTorch OIHW layout."""
    N, C_in, H, W = x.shape
    o_sq = wsq.shape[0]
    o_ex1 = we1.shape[0]
    o_ex3 = we3.shape[0]
    C_out = o_ex1 + o_ex3
    L = H * W
    assert W + 1 <= 128, "width too large for the 128-lane padding scheme used here"
    PAD = 128                       # lane-aligned zero pad on both ends (>= W+1)
    LP = L + 2 * PAD

    # ---- wrapper-side layout plumbing (free XLA reshapes/transposes) ----
    x2 = x.reshape(N, C_in, L).astype(jnp.float32)
    wsq2 = wsq.reshape(o_sq, C_in).astype(jnp.float32)
    we1_2 = we1.reshape(o_ex1, o_sq).astype(jnp.float32)
    # (o_ex3, o_sq, 3, 3) -> (9, o_ex3, o_sq); tap index k = dh*3 + dw
    we3_2 = jnp.transpose(we3, (2, 3, 0, 1)).reshape(9, o_ex3, o_sq).astype(jnp.float32)
    bsq2 = bsq.reshape(o_sq, 1).astype(jnp.float32)
    be1_2 = be1.reshape(o_ex1, 1).astype(jnp.float32)
    be3_2 = be3.reshape(o_ex3, 1).astype(jnp.float32)

    # Column-validity masks for horizontally shifted 3x3 taps (padding=1).
    col = jnp.arange(L, dtype=jnp.int32) % W
    mask_l = (col != 0).astype(jnp.float32).reshape(1, L)      # taps with ow = -1
    mask_r = (col != W - 1).astype(jnp.float32).reshape(1, L)  # taps with ow = +1

    def kernel(x_ref, wsq_ref, bsq_ref, we1_ref, be1_ref, we3_ref, be3_ref,
               ml_ref, mr_ref, out_ref, spad_ref):
        x_p = x_ref[0]                                          # (C_in, L)

        # --- squeeze 1x1 + ReLU (MXU matmul, lane-dense) ---
        s = jnp.dot(wsq_ref[...], x_p, preferred_element_type=jnp.float32)
        s = jnp.maximum(s + bsq_ref[...], 0.0)                  # (o_sq, L)

        # --- expand 1x1 + ReLU ---
        e1 = jnp.dot(we1_ref[...], s, preferred_element_type=jnp.float32)
        e1 = jnp.maximum(e1 + be1_ref[...], 0.0)                # (o_ex1, L)

        # --- expand 3x3 (padding=1): padded flat spatial axis + 9 shifted matmuls ---
        spad_ref[...] = jnp.zeros_like(spad_ref)
        spad_ref[:, PAD:PAD + L] = s                            # lane-aligned store
        ml = ml_ref[...]
        mr = mr_ref[...]
        acc = jnp.zeros((o_ex3, L), jnp.float32)
        for dh in range(3):
            for dw in range(3):
                oh, ow = dh - 1, dw - 1
                start = PAD + oh * W + ow                       # static offset
                win = spad_ref[:, start:start + L]              # (o_sq, L)
                if ow == -1:
                    win = win * ml
                elif ow == 1:
                    win = win * mr
                acc = acc + jnp.dot(we3_ref[dh * 3 + dw], win,
                                    preferred_element_type=jnp.float32)
        e3 = jnp.maximum(acc + be3_ref[...], 0.0)               # (o_ex3, L)

        # --- channel concat: two sublane-offset stores into one lane-dense block ---
        out_ref[0, :o_ex1, :] = e1
        out_ref[0, o_ex1:, :] = e3

    out2 = pl.pallas_call(
        kernel,
        out_shape=jax.ShapeDtypeStruct((N, C_out, L), jnp.float32),
        grid_spec=pltpu.PrefetchScalarGridSpec(
            num_scalar_prefetch=0,
            grid=(N,),
            in_specs=[
                pl.BlockSpec((1, C_in, L), lambda n: (n, 0, 0)),
                pl.BlockSpec((o_sq, C_in), lambda n: (0, 0)),
                pl.BlockSpec((o_sq, 1), lambda n: (0, 0)),
                pl.BlockSpec((o_ex1, o_sq), lambda n: (0, 0)),
                pl.BlockSpec((o_ex1, 1), lambda n: (0, 0)),
                pl.BlockSpec((9, o_ex3, o_sq), lambda n: (0, 0, 0)),
                pl.BlockSpec((o_ex3, 1), lambda n: (0, 0)),
                pl.BlockSpec((1, L), lambda n: (0, 0)),
                pl.BlockSpec((1, L), lambda n: (0, 0)),
            ],
            out_specs=pl.BlockSpec((1, C_out, L), lambda n: (n, 0, 0)),
            scratch_shapes=[pltpu.VMEM((o_sq, LP), jnp.float32)],
        ),
        compiler_params=pltpu.CompilerParams(
            dimension_semantics=("parallel",),
        ),
    )(x2, wsq2, bsq2, we1_2, be1_2, we3_2, be3_2, mask_l, mask_r)

    return out2.reshape(N, C_out, H, W)


def fire_reference(x, wsq, bsq, we1, be1, we3, be3):
    """Pure-JAX reference (lax.conv), same semantics as the PyTorch Fire module."""
    dn = ("NCHW", "OIHW", "NCHW")
    hp = jax.lax.Precision.HIGHEST
    s = jax.nn.relu(
        jax.lax.conv_general_dilated(x, wsq, (1, 1), "VALID",
                                     dimension_numbers=dn, precision=hp)
        + bsq[None, :, None, None])
    e1 = jax.nn.relu(
        jax.lax.conv_general_dilated(s, we1, (1, 1), "VALID",
                                     dimension_numbers=dn, precision=hp)
        + be1[None, :, None, None])
    e3 = jax.nn.relu(
        jax.lax.conv_general_dilated(s, we3, (1, 1), ((1, 1), (1, 1)),
                                     dimension_numbers=dn, precision=hp)
        + be3[None, :, None, None])
    return jnp.concatenate([e1, e3], axis=1)


if __name__ == "__main__":
    key = jax.random.PRNGKey(0)
    ks = jax.random.split(key, 7)

    # Fire(inputs=4, o_sq1x1=8, o_ex1x1=16, o_ex3x3=16) on a (2, 4, 16, 16) input.
    N, C_in, H, W = 2, 4, 16, 16
    o_sq, o_ex1, o_ex3 = 8, 16, 16

    x = jax.random.normal(ks[0], (N, C_in, H, W), dtype=jnp.float32)
    wsq = jax.random.normal(ks[1], (o_sq, C_in, 1, 1), dtype=jnp.float32) * 0.5
    bsq = jax.random.normal(ks[2], (o_sq,), dtype=jnp.float32) * 0.1
    we1 = jax.random.normal(ks[3], (o_ex1, o_sq, 1, 1), dtype=jnp.float32) * 0.5
    be1 = jax.random.normal(ks[4], (o_ex1,), dtype=jnp.float32) * 0.1
    we3 = jax.random.normal(ks[5], (o_ex3, o_sq, 3, 3), dtype=jnp.float32) * 0.5
    be3 = jax.random.normal(ks[6], (o_ex3,), dtype=jnp.float32) * 0.1

    y = fire_forward(x, wsq, bsq, we1, be1, we3, be3)
    y = jax.block_until_ready(y)

    y_ref = fire_reference(x, wsq, bsq, we1, be1, we3, be3)
    assert y.shape == (N, o_ex1 + o_ex3, H, W), y.shape
    max_err = jnp.max(jnp.abs(y - y_ref))
    assert jnp.allclose(y, y_ref, atol=1e-3, rtol=1e-3), (
        f"mismatch vs reference, max abs err = {max_err}")

    print("KERNEL_OK")
</pallas_src>

<mosaic_0001>
module attributes {stable_mosaic.version = 11 : i64} {
  func.func @kernel(%arg0: i32, %arg1: memref<1x4x256xf32, #tpu.memory_space<vmem>>, %arg2: memref<8x4xf32, #tpu.memory_space<vmem>>, %arg3: memref<8x1xf32, #tpu.memory_space<vmem>>, %arg4: memref<16x8xf32, #tpu.memory_space<vmem>>, %arg5: memref<16x1xf32, #tpu.memory_space<vmem>>, %arg6: memref<9x16x8xf32, #tpu.memory_space<vmem>>, %arg7: memref<16x1xf32, #tpu.memory_space<vmem>>, %arg8: memref<1x256xf32, #tpu.memory_space<vmem>>, %arg9: memref<1x256xf32, #tpu.memory_space<vmem>>, %arg10: memref<1x32x256xf32, #tpu.memory_space<vmem>>, %arg11: memref<8x512xf32, #tpu.memory_space<vmem>>) attributes {dimension_semantics = [#tpu.dimension_semantics<parallel>], iteration_bounds = array<i64: 2>, scalar_prefetch = 0 : i64, scratch_operands = 1 : i64, tpu.core_type = #tpu.core_type<tc>, window_params = [{transform_indices = @transform_0, window_bounds = array<i64: 1, 4, 256>}, {pipeline_mode = #tpu.pipeline_mode<synchronous>, transform_indices = @transform_1, window_bounds = array<i64: 8, 4>}, {pipeline_mode = #tpu.pipeline_mode<synchronous>, transform_indices = @transform_2, window_bounds = array<i64: 8, 1>}, {pipeline_mode = #tpu.pipeline_mode<synchronous>, transform_indices = @transform_3, window_bounds = array<i64: 16, 8>}, {pipeline_mode = #tpu.pipeline_mode<synchronous>, transform_indices = @transform_4, window_bounds = array<i64: 16, 1>}, {pipeline_mode = #tpu.pipeline_mode<synchronous>, transform_indices = @transform_5, window_bounds = array<i64: 9, 16, 8>}, {pipeline_mode = #tpu.pipeline_mode<synchronous>, transform_indices = @transform_6, window_bounds = array<i64: 16, 1>}, {pipeline_mode = #tpu.pipeline_mode<synchronous>, transform_indices = @transform_7, window_bounds = array<i64: 1, 256>}, {pipeline_mode = #tpu.pipeline_mode<synchronous>, transform_indices = @transform_8, window_bounds = array<i64: 1, 256>}, {transform_indices = @transform_9, window_bounds = array<i64: 1, 32, 256>}]} {
    %c0 = arith.constant 0 : index
    %c0_0 = arith.constant 0 : index
    %c0_1 = arith.constant 0 : index
    %0 = vector.load %arg1[%c0, %c0_0, %c0_1] : memref<1x4x256xf32, #tpu.memory_space<vmem>>, vector<1x4x256xf32>
    %1 = vector.shape_cast %0 : vector<1x4x256xf32> to vector<4x256xf32>
    %c0_2 = arith.constant 0 : index
    %c0_3 = arith.constant 0 : index
    %2 = vector.load %arg2[%c0_2, %c0_3] : memref<8x4xf32, #tpu.memory_space<vmem>>, vector<8x4xf32>
    %cst = arith.constant dense<0.000000e+00> : vector<8x256xf32>
    %3 = tpu.matmul %2, %1, %cst {dimension_numbers = #tpu.dot_dimension_numbers<[1], [0], [0], [1], [0, 0, 1, 1], [], []>} : vector<8x4xf32>, vector<4x256xf32>, vector<8x256xf32> -> vector<8x256xf32>
    %c0_4 = arith.constant 0 : index
    %c0_5 = arith.constant 0 : index
    %4 = vector.load %arg3[%c0_4, %c0_5] : memref<8x1xf32, #tpu.memory_space<vmem>>, vector<8x1xf32>
    %5 = vector.broadcast %4 : vector<8x1xf32> to vector<8x256xf32>
    %6 = arith.addf %3, %5 : vector<8x256xf32>
    %cst_6 = arith.constant 0.000000e+00 : f32
    %7 = vector.broadcast %cst_6 : f32 to vector<8x256xf32>
    %8 = arith.maximumf %6, %7 : vector<8x256xf32>
    %c0_7 = arith.constant 0 : index
    %c0_8 = arith.constant 0 : index
    %9 = vector.load %arg4[%c0_7, %c0_8] : memref<16x8xf32, #tpu.memory_space<vmem>>, vector<16x8xf32>
    %cst_9 = arith.constant dense<0.000000e+00> : vector<16x256xf32>
    %10 = tpu.matmul %9, %8, %cst_9 {dimension_numbers = #tpu.dot_dimension_numbers<[1], [0], [0], [1], [0, 0, 1, 1], [], []>} : vector<16x8xf32>, vector<8x256xf32>, vector<16x256xf32> -> vector<16x256xf32>
    %c0_10 = arith.constant 0 : index
    %c0_11 = arith.constant 0 : index
    %11 = vector.load %arg5[%c0_10, %c0_11] : memref<16x1xf32, #tpu.memory_space<vmem>>, vector<16x1xf32>
    %12 = vector.broadcast %11 : vector<16x1xf32> to vector<16x256xf32>
    %13 = arith.addf %10, %12 : vector<16x256xf32>
    %cst_12 = arith.constant 0.000000e+00 : f32
    %14 = vector.broadcast %cst_12 : f32 to vector<16x256xf32>
    %15 = arith.maximumf %13, %14 : vector<16x256xf32>
    %cst_13 = arith.constant 0.000000e+00 : f32
    %16 = vector.broadcast %cst_13 : f32 to vector<8x512xf32>
    %c0_14 = arith.constant 0 : index
    %c0_15 = arith.constant 0 : index
    %17 = vector.load %arg11[%c0_14, %c0_15] : memref<8x512xf32, #tpu.memory_space<vmem>>, vector<8x512xf32>
    tpu.vector_store %arg11[%c0_14, %c0_15], %16 {strides = array<i32>} : memref<8x512xf32, #tpu.memory_space<vmem>>, vector<8x512xf32>,
    %c0_16 = arith.constant 0 : index
    %c128 = arith.constant 128 : index
    %18 = vector.load %arg11[%c0_16, %c128] : memref<8x512xf32, #tpu.memory_space<vmem>>, vector<8x256xf32>
    tpu.vector_store %arg11[%c0_16, %c128], %8 {strides = array<i32>} : memref<8x512xf32, #tpu.memory_space<vmem>>, vector<8x256xf32>,
    %c0_17 = arith.constant 0 : index
    %c0_18 = arith.constant 0 : index
    %19 = vector.load %arg8[%c0_17, %c0_18] : memref<1x256xf32, #tpu.memory_space<vmem>>, vector<1x256xf32>
    %c0_19 = arith.constant 0 : index
    %c0_20 = arith.constant 0 : index
    %20 = vector.load %arg9[%c0_19, %c0_20] : memref<1x256xf32, #tpu.memory_space<vmem>>, vector<1x256xf32>
    %cst_21 = arith.constant 0.000000e+00 : f32
    %21 = vector.broadcast %cst_21 : f32 to vector<16x256xf32>
    %c0_22 = arith.constant 0 : index
    %c111 = arith.constant 111 : index
    %22 = vector.load %arg11[%c0_22, %c111] : memref<8x512xf32, #tpu.memory_space<vmem>>, vector<8x256xf32>
    %23 = vector.broadcast %19 : vector<1x256xf32> to vector<8x256xf32>
    %24 = arith.mulf %22, %23 : vector<8x256xf32>
    %c0_23 = arith.constant 0 : index
    %c0_24 = arith.constant 0 : index
    %c0_25 = arith.constant 0 : index
    %25 = vector.load %arg6[%c0_23, %c0_24, %c0_25] : memref<9x16x8xf32, #tpu.memory_space<vmem>>, vector<1x16x8xf32>
    %26 = vector.shape_cast %25 : vector<1x16x8xf32> to vector<16x8xf32>
    %cst_26 = arith.constant dense<0.000000e+00> : vector<16x256xf32>
    %27 = tpu.matmul %26, %24, %cst_26 {dimension_numbers = #tpu.dot_dimension_numbers<[1], [0], [0], [1], [0, 0, 1, 1], [], []>} : vector<16x8xf32>, vector<8x256xf32>, vector<16x256xf32> -> vector<16x256xf32>
    %28 = arith.addf %21, %27 : vector<16x256xf32>
    %c0_27 = arith.constant 0 : index
    %c112 = arith.constant 112 : index
    %29 = vector.load %arg11[%c0_27, %c112] : memref<8x512xf32, #tpu.memory_space<vmem>>, vector<8x256xf32>
    %c1 = arith.constant 1 : index
    %c0_28 = arith.constant 0 : index
    %c0_29 = arith.constant 0 : index
    %30 = vector.load %arg6[%c1, %c0_28, %c0_29] : memref<9x16x8xf32, #tpu.memory_space<vmem>>, vector<1x16x8xf32>
    %31 = vector.shape_cast %30 : vector<1x16x8xf32> to vector<16x8xf32>
    %cst_30 = arith.constant dense<0.000000e+00> : vector<16x256xf32>
    %32 = tpu.matmul %31, %29, %cst_30 {dimension_numbers = #tpu.dot_dimension_numbers<[1], [0], [0], [1], [0, 0, 1, 1], [], []>} : vector<16x8xf32>, vector<8x256xf32>, vector<16x256xf32> -> vector<16x256xf32>
    %33 = arith.addf %28, %32 : vector<16x256xf32>
    %c0_31 = arith.constant 0 : index
    %c113 = arith.constant 113 : index
    %34 = vector.load %arg11[%c0_31, %c113] : memref<8x512xf32, #tpu.memory_space<vmem>>, vector<8x256xf32>
    %35 = vector.broadcast %20 : vector<1x256xf32> to vector<8x256xf32>
    %36 = arith.mulf %34, %35 : vector<8x256xf32>
    %c2 = arith.constant 2 : index
    %c0_32 = arith.constant 0 : index
    %c0_33 = arith.constant 0 : index
    %37 = vector.load %arg6[%c2, %c0_32, %c0_33] : memref<9x16x8xf32, #tpu.memory_space<vmem>>, vector<1x16x8xf32>
    %38 = vector.shape_cast %37 : vector<1x16x8xf32> to vector<16x8xf32>
    %cst_34 = arith.constant dense<0.000000e+00> : vector<16x256xf32>
    %39 = tpu.matmul %38, %36, %cst_34 {dimension_numbers = #tpu.dot_dimension_numbers<[1], [0], [0], [1], [0, 0, 1, 1], [], []>} : vector<16x8xf32>, vector<8x256xf32>, vector<16x256xf32> -> vector<16x256xf32>
    %40 = arith.addf %33, %39 : vector<16x256xf32>
    %c0_35 = arith.constant 0 : index
    %c127 = arith.constant 127 : index
    %41 = vector.load %arg11[%c0_35, %c127] : memref<8x512xf32, #tpu.memory_space<vmem>>, vector<8x256xf32>
    %42 = vector.broadcast %19 : vector<1x256xf32> to vector<8x256xf32>
    %43 = arith.mulf %41, %42 : vector<8x256xf32>
    %c3 = arith.constant 3 : index
    %c0_36 = arith.constant 0 : index
    %c0_37 = arith.constant 0 : index
    %44 = vector.load %arg6[%c3, %c0_36, %c0_37] : memref<9x16x8xf32, #tpu.memory_space<vmem>>, vector<1x16x8xf32>
    %45 = vector.shape_cast %44 : vector<1x16x8xf32> to vector<16x8xf32>
    %cst_38 = arith.constant dense<0.000000e+00> : vector<16x256xf32>
    %46 = tpu.matmul %45, %43, %cst_38 {dimension_numbers = #tpu.dot_dimension_numbers<[1], [0], [0], [1], [0, 0, 1, 1], [], []>} : vector<16x8xf32>, vector<8x256xf32>, vector<16x256xf32> -> vector<16x256xf32>
    %47 = arith.addf %40, %46 : vector<16x256xf32>
    %c0_39 = arith.constant 0 : index
    %c128_40 = arith.constant 128 : index
    %48 = vector.load %arg11[%c0_39, %c128_40] : memref<8x512xf32, #tpu.memory_space<vmem>>, vector<8x256xf32>
    %c4 = arith.constant 4 : index
    %c0_41 = arith.constant 0 : index
    %c0_42 = arith.constant 0 : index
    %49 = vector.load %arg6[%c4, %c0_41, %c0_42] : memref<9x16x8xf32, #tpu.memory_space<vmem>>, vector<1x16x8xf32>
    %50 = vector.shape_cast %49 : vector<1x16x8xf32> to vector<16x8xf32>
    %cst_43 = arith.constant dense<0.000000e+00> : vector<16x256xf32>
    %51 = tpu.matmul %50, %48, %cst_43 {dimension_numbers = #tpu.dot_dimension_numbers<[1], [0], [0], [1], [0, 0, 1, 1], [], []>} : vector<16x8xf32>, vector<8x256xf32>, vector<16x256xf32> -> vector<16x256xf32>
    %52 = arith.addf %47, %51 : vector<16x256xf32>
    %c0_44 = arith.constant 0 : index
    %c129 = arith.constant 129 : index
    %53 = vector.load %arg11[%c0_44, %c129] : memref<8x512xf32, #tpu.memory_space<vmem>>, vector<8x256xf32>
    %54 = vector.broadcast %20 : vector<1x256xf32> to vector<8x256xf32>
    %55 = arith.mulf %53, %54 : vector<8x256xf32>
    %c5 = arith.constant 5 : index
    %c0_45 = arith.constant 0 : index
    %c0_46 = arith.constant 0 : index
    %56 = vector.load %arg6[%c5, %c0_45, %c0_46] : memref<9x16x8xf32, #tpu.memory_space<vmem>>, vector<1x16x8xf32>
    %57 = vector.shape_cast %56 : vector<1x16x8xf32> to vector<16x8xf32>
    %cst_47 = arith.constant dense<0.000000e+00> : vector<16x256xf32>
    %58 = tpu.matmul %57, %55, %cst_47 {dimension_numbers = #tpu.dot_dimension_numbers<[1], [0], [0], [1], [0, 0, 1, 1], [], []>} : vector<16x8xf32>, vector<8x256xf32>, vector<16x256xf32> -> vector<16x256xf32>
    %59 = arith.addf %52, %58 : vector<16x256xf32>
    %c0_48 = arith.constant 0 : index
    %c143 = arith.constant 143 : index
    %60 = vector.load %arg11[%c0_48, %c143] : memref<8x512xf32, #tpu.memory_space<vmem>>, vector<8x256xf32>
    %61 = vector.broadcast %19 : vector<1x256xf32> to vector<8x256xf32>
    %62 = arith.mulf %60, %61 : vector<8x256xf32>
    %c6 = arith.constant 6 : index
    %c0_49 = arith.constant 0 : index
    %c0_50 = arith.constant 0 : index
    %63 = vector.load %arg6[%c6, %c0_49, %c0_50] : memref<9x16x8xf32, #tpu.memory_space<vmem>>, vector<1x16x8xf32>
    %64 = vector.shape_cast %63 : vector<1x16x8xf32> to vector<16x8xf32>
    %cst_51 = arith.constant dense<0.000000e+00> : vector<16x256xf32>
    %65 = tpu.matmul %64, %62, %cst_51 {dimension_numbers = #tpu.dot_dimension_numbers<[1], [0], [0], [1], [0, 0, 1, 1], [], []>} : vector<16x8xf32>, vector<8x256xf32>, vector<16x256xf32> -> vector<16x256xf32>
    %66 = arith.addf %59, %65 : vector<16x256xf32>
    %c0_52 = arith.constant 0 : index
    %c144 = arith.constant 144 : index
    %67 = vector.load %arg11[%c0_52, %c144] : memref<8x512xf32, #tpu.memory_space<vmem>>, vector<8x256xf32>
    %c7 = arith.constant 7 : index
    %c0_53 = arith.constant 0 : index
    %c0_54 = arith.constant 0 : index
    %68 = vector.load %arg6[%c7, %c0_53, %c0_54] : memref<9x16x8xf32, #tpu.memory_space<vmem>>, vector<1x16x8xf32>
    %69 = vector.shape_cast %68 : vector<1x16x8xf32> to vector<16x8xf32>
    %cst_55 = arith.constant dense<0.000000e+00> : vector<16x256xf32>
    %70 = tpu.matmul %69, %67, %cst_55 {dimension_numbers = #tpu.dot_dimension_numbers<[1], [0], [0], [1], [0, 0, 1, 1], [], []>} : vector<16x8xf32>, vector<8x256xf32>, vector<16x256xf32> -> vector<16x256xf32>
    %71 = arith.addf %66, %70 : vector<16x256xf32>
    %c0_56 = arith.constant 0 : index
    %c145 = arith.constant 145 : index
    %72 = vector.load %arg11[%c0_56, %c145] : memref<8x512xf32, #tpu.memory_space<vmem>>, vector<8x256xf32>
    %73 = vector.broadcast %20 : vector<1x256xf32> to vector<8x256xf32>
    %74 = arith.mulf %72, %73 : vector<8x256xf32>
    %c8 = arith.constant 8 : index
    %c0_57 = arith.constant 0 : index
    %c0_58 = arith.constant 0 : index
    %75 = vector.load %arg6[%c8, %c0_57, %c0_58] : memref<9x16x8xf32, #tpu.memory_space<vmem>>, vector<1x16x8xf32>
    %76 = vector.shape_cast %75 : vector<1x16x8xf32> to vector<16x8xf32>
    %cst_59 = arith.constant dense<0.000000e+00> : vector<16x256xf32>
    %77 = tpu.matmul %76, %74, %cst_59 {dimension_numbers = #tpu.dot_dimension_numbers<[1], [0], [0], [1], [0, 0, 1, 1], [], []>} : vector<16x8xf32>, vector<8x256xf32>, vector<16x256xf32> -> vector<16x256xf32>
    %78 = arith.addf %71, %77 : vector<16x256xf32>
    %c0_60 = arith.constant 0 : index
    %c0_61 = arith.constant 0 : index
    %79 = vector.load %arg7[%c0_60, %c0_61] : memref<16x1xf32, #tpu.memory_space<vmem>>, vector<16x1xf32>
    %80 = vector.broadcast %79 : vector<16x1xf32> to vector<16x256xf32>
    %81 = arith.addf %78, %80 : vector<16x256xf32>
    %cst_62 = arith.constant 0.000000e+00 : f32
    %82 = vector.broadcast %cst_62 : f32 to vector<16x256xf32>
    %83 = arith.maximumf %81, %82 : vector<16x256xf32>
    %c0_63 = arith.constant 0 : index
    %c0_64 = arith.constant 0 : index
    %c0_65 = arith.constant 0 : index
    %84 = vector.load %arg10[%c0_63, %c0_64, %c0_65] : memref<1x32x256xf32, #tpu.memory_space<vmem>>, vector<1x16x256xf32>
    %85 = vector.shape_cast %84 : vector<1x16x256xf32> to vector<16x256xf32>
    %86 = vector.shape_cast %15 : vector<16x256xf32> to vector<1x16x256xf32>
    tpu.vector_store %arg10[%c0_63, %c0_64, %c0_65], %86 {strides = array<i32>} : memref<1x32x256xf32, #tpu.memory_space<vmem>>, vector<1x16x256xf32>,
    %c0_66 = arith.constant 0 : index
    %c16 = arith.constant 16 : index
    %c0_67 = arith.constant 0 : index
    %87 = vector.load %arg10[%c0_66, %c16, %c0_67] : memref<1x32x256xf32, #tpu.memory_space<vmem>>, vector<1x16x256xf32>
    %88 = vector.shape_cast %87 : vector<1x16x256xf32> to vector<16x256xf32>
    %89 = vector.shape_cast %83 : vector<16x256xf32> to vector<1x16x256xf32>
    tpu.vector_store %arg10[%c0_66, %c16, %c0_67], %89 {strides = array<i32>} : memref<1x32x256xf32, #tpu.memory_space<vmem>>, vector<1x16x256xf32>,
    return
  }
  func.func @transform_0(%arg0: i32) -> (i32, i32, i32) {
    %c0_i32 = arith.constant 0 : i32
    %c0_i32_0 = arith.constant 0 : i32
    %c0_i32_1 = arith.constant 0 : i32
    return %arg0, %c0_i32, %c0_i32_0 : i32, i32, i32
  }
  func.func @transform_1(%arg0: i32) -> (i32, i32) {
    %c0_i32 = arith.constant 0 : i32
    %c0_i32_0 = arith.constant 0 : i32
    %c0_i32_1 = arith.constant 0 : i32
    return %c0_i32, %c0_i32_0 : i32, i32
  }
  func.func @transform_2(%arg0: i32) -> (i32, i32) {
    %c0_i32 = arith.constant 0 : i32
    %c0_i32_0 = arith.constant 0 : i32
    %c0_i32_1 = arith.constant 0 : i32
    return %c0_i32, %c0_i32_0 : i32, i32
  }
  func.func @transform_3(%arg0: i32) -> (i32, i32) {
    %c0_i32 = arith.constant 0 : i32
    %c0_i32_0 = arith.constant 0 : i32
    %c0_i32_1 = arith.constant 0 : i32
    return %c0_i32, %c0_i32_0 : i32, i32
  }
  func.func @transform_4(%arg0: i32) -> (i32, i32) {
    %c0_i32 = arith.constant 0 : i32
    %c0_i32_0 = arith.constant 0 : i32
    %c0_i32_1 = arith.constant 0 : i32
    return %c0_i32, %c0_i32_0 : i32, i32
  }
  func.func @transform_5(%arg0: i32) -> (i32, i32, i32) {
    %c0_i32 = arith.constant 0 : i32
    %c0_i32_0 = arith.constant 0 : i32
    %c0_i32_1 = arith.constant 0 : i32
    %c0_i32_2 = arith.constant 0 : i32
    return %c0_i32, %c0_i32_0, %c0_i32_1 : i32, i32, i32
  }
  func.func @transform_6(%arg0: i32) -> (i32, i32) {
    %c0_i32 = arith.constant 0 : i32
    %c0_i32_0 = arith.constant 0 : i32
    %c0_i32_1 = arith.constant 0 : i32
    return %c0_i32, %c0_i32_0 : i32, i32
  }
  func.func @transform_7(%arg0: i32) -> (i32, i32) {
    %c0_i32 = arith.constant 0 : i32
    %c0_i32_0 = arith.constant 0 : i32
    %c0_i32_1 = arith.constant 0 : i32
    return %c0_i32, %c0_i32_0 : i32, i32
  }
  func.func @transform_8(%arg0: i32) -> (i32, i32) {
    %c0_i32 = arith.constant 0 : i32
    %c0_i32_0 = arith.constant 0 : i32
    %c0_i32_1 = arith.constant 0 : i32
    return %c0_i32, %c0_i32_0 : i32, i32
  }
  func.func @transform_9(%arg0: i32) -> (i32, i32, i32) {
    %c0_i32 = arith.constant 0 : i32
    %c0_i32_0 = arith.constant 0 : i32
    %c0_i32_1 = arith.constant 0 : i32
    return %arg0, %c0_i32, %c0_i32_0 : i32, i32, i32
  }
}

</mosaic_0001>

<bundles_post_ra>
// kernel: tpu_custom_call.1
= control target key start
LH: loop header
LB: loop body
LE: loop exit
PB: predicated region body
PF: predicated region fallthrough
CT: control target
= control target key end

     0   :  { %14 = vsyncpa [#allocation4], 0  ;;  %s2213_s0 = inlined_call_operand.vmem [shape: f32[2,4,256], index: 0, kind: input, shape index: {}]   ;;  %s2214_s1 = inlined_call_operand.vmem [shape: f32[8,4], index: 1, kind: input, shape index: {}]   ;;  %s2215_s2 = inlined_call_operand.vmem [shape: f32[8,1], index: 2, kind: input, shape index: {}]   ;;  %s2216_s3 = inlined_call_operand.vmem [shape: f32[16,8], index: 3, kind: input, shape index: {}]   ;;  %s2217_s4 = inlined_call_operand.vmem [shape: f32[16,1], index: 4, kind: input, shape index: {}]   ;;  %s2218_s5 = inlined_call_operand.vmem [shape: f32[9,16,8], index: 5, kind: input, shape index: {}]   ;;  %s2219_s6 = inlined_call_operand.vmem [shape: f32[16,1], index: 6, kind: input, shape index: {}]   ;;  %s2220_s7 = inlined_call_operand.vmem [shape: f32[1,256], index: 7, kind: input, shape index: {}]   ;;  %s2221_s8 = inlined_call_operand.vmem [shape: f32[1,256], index: 8, kind: input, shape index: {}]   ;;  %s2222_s9 = inlined_call_operand.hbm [shape: f32[2,32,256], index: 9, kind: output, shape index: {}]  }
   0x1   :  { %16 = vsyncpa [#allocation4 + $0x1], 0  ;;  %s1904_s30 = smov 0   ;;  %s1906_s10 = smov 0  }
   0x2   :  { %s1908_s11 = smov 0   ;;  %s1910_s12 = smov 0  }
   0x3 LB: > { %s1925_s13 = sadd.s32 4294967295, %s1840_s12   ;;  %s1640_s14 = sadd.s32 4294967294, %s1840_s12   ;;  %s1840_s12 = sphi %s1910_s12, %s2228_s12   ;;  %s1836_s11 = sphi %s1908_s11, %s2227_s11   ;;  %s1832_s10 = sphi %s1906_s10, %s2226_s10   ;;  %s1828_s30 = sphi %s1904_s30, %s2225_s30  }
   0x4   : > { %s1929_s15 = sadd.s32 1, %s1840_s12   ;;  %s223_s16 = sadd.s32 1, %s1836_s11 }
   0x5   : > { %s220_s17 = ssub.s32 %s1840_s12, %s1929_s15  ;;  %p233_p0 = scmp.ne.s32.totalorder %s1836_s11, %s1832_s10 }
   0x6   : > { %p221_p1 = scmp.eq.s32.totalorder %s220_s17, 0  ;;  %p234_p2 = scmp.eq.s32.totalorder %s1925_s13, 1 }
   0x7   : > { %p239_p3 = scmp.ne.s32.totalorder %s1832_s10, %s1828_s30  ;;  %p240_p4 = scmp.eq.s32.totalorder %s1640_s14, 1 }
   0x8   : > { %s1940_s18 = scalar_select %p221_p1, %s1836_s11, %s223_s16  }
   0x9   : > { %p1942_p5 = por %p234_p2, %p233_p0  ;;  %p1946_p6 = por %p240_p4, %p239_p3 }
   0xa   : > { %p1643_p7 = scmp.ge.s32.totalorder %s1840_s12, 1  ;;  %p290_p8 = scmp.lt.s32.totalorder %s1840_s12, 3 }
   0xc   : > { %p291_p9 = pnand %p1643_p7, %p290_p8 }
   0xd   : > { %p326_p10 = scmp.lt.s32.totalorder (!%p291_p9), %s1925_s13, 1  ;;  %v1842_v0 = vmov (!%p291_p9), 0.0   ;;  %v1843_v1 = vmov (!%p291_p9), 0   ;;  %v333_v2 = vld [vmem:[%s2215_s2] sm:$0xff] (!%p291_p9)  ;;  %v537_v3 = vlaneseq (!%p291_p9)  ;;  %vm345_vm0 = vcmask (!%p291_p9), 1043456   ;;  %s1844_s22 = smov (!%p291_p9), 1  }
   0xe   : > { %294 = sbr.rel (%p291_p9) target bundleno = 638 (0x27e), region = 56  ;;  %414 = vmatprep.mubr.f32.mxu0 (!%p291_p9), %v1842_v0  ;;  %1775 = vset.pattern.permute.xlu0 (!%p291_p9), %v1843_v1  ;;  %v532_v5 = vld [vmem:[%s2221_s8] sm:$0x3] (!%p291_p9)  ;;  %vm341_vm1 = vcmask (!%p291_p9), 31744   ;;  %s1847_s25 = smov (!%p291_p9), 113   ;;  %vm549_vm2 = vcmask (!%p291_p9), 908288  }
   0xf   : > { %336 = vperm.xlu0 (!%p291_p9), %1775, %v333_v2   ;;  %508 = vmatprep.mubr.f32.mxu1 (!%p291_p9), %v1842_v0  ;;  %v538_v4 = vshrl.u32 (!%p291_p9), %v537_v3, 7  ;;  %v531_v9 = vld [vmem:[%s2220_s7] sm:$0x3] (!%p291_p9)  ;;  %s1848_s26 = smov (!%p291_p9), 127   ;;  %s1849_s27 = smov (!%p291_p9), 17   ;;  %vm905_vm3 = vcmask (!%p291_p9), 7168  }
  0x10   : > { %1776 = vset.pattern.permute.xlu1 (!%p291_p9), %v1843_v1  ;;  %v332_v13 = vld [vmem:[%s2214_s1] sm:$0xff] (!%p291_p9)  ;;  %s1850_s28 = smov (!%p291_p9), 16   ;;  %vm789_vm4 = vcmask (!%p291_p9), 121856   ;;  %vm437_vm5 = vcmask (!%p291_p9), 64512   ;;  %vm769_vm6 = vcmask (!%p291_p9), 924672   ;;  %v424_v41 = vld [vmem:[%s2216_s3 + $0x8] sm:$0xff] (!%p291_p9) }
  0x11   : > { %v543_v6 = vsub.s32 (!%p291_p9), 1, %v538_v4  ;;  %v539_v7 = vsub.s32 (!%p291_p9), 0, %v538_v4  ;;  %v423_v34 = vld [vmem:[%s2216_s3] sm:$0xff] (!%p291_p9)  ;;  %v1667_v44 = vld [vmem:[%s2218_s5 + $0x48] sm:$0xff] (!%p291_p9)  ;;  %s1851_s17 = smov (!%p291_p9), 112   ;;  %vm885_vm7 = vcmask (!%p291_p9), 1039360  }
  0x12   : > { %v1666_v39 = vld [vmem:[%s2218_s5 + $0x40] sm:$0xff] (!%p291_p9)  ;;  %vm668_vm8 = vcmask (!%p291_p9), 138240   ;;  %v426_v63 = vld [vmem:[%s2217_s4 + $0x8] sm:$0xff] (!%p291_p9)  ;;  %vm571_vm9 = vcmask (!%p291_p9), 130048   ;;  %vm1330_vm10 = vcmask (!%p291_p9), 916480   ;;  %s323_s16 = sand.u32 (!%p291_p9), 1, %s1832_s10  }
  0x13   : > { %v764_v11 = vrot.slane (!%p291_p9), %v532_v5, %v543_v6  ;;  %v760_v12 = vrot.slane (!%p291_p9), %v532_v5, %v539_v7  ;;  %v540_v14 = vrot.slane (!%p291_p9), %v531_v9, %v539_v7  ;;  %v544_v15 = vrot.slane (!%p291_p9), %v531_v9, %v543_v6  ;;  %v1537_v1 = vld [vmem:[%s2219_s6 + $0x8] sm:$0xff] (!%p291_p9)  ;;  %v425_v2 = vld [vmem:[%s2217_s4] sm:$0xff] (!%p291_p9) }
  0x14   : > { %v1536_v3 = vld [vmem:[%s2219_s6] sm:$0xff] (!%p291_p9) }
  0x15   : > { %s327_s23 = scalar_select %p326_p10, %s1925_s13, 1  ;;  %1092 = vrot.lane.b32.xlu1 %v764_v11, %s1844_s22  ;;  %1090 = vrot.lane.b32.xlu0 %v760_v12, %s1844_s22 }
  0x17   : > { %s1691_s24 = sshll.u32 %s327_s23, 3  ;;  %s1845_s23 = smov 111  }
  0x18   : > { %s330_s29 = scalar_lea.vmem %s2213_s0, %s1691_s24  ;;  %s1846_s24 = smov 15  }
  0x19   : > { %v331_v8 = vld [vmem:[%s330_s29] sm:$0xff]  ;;  %545 = vrot.lane.b32.xlu1 %v540_v14, %s1845_s23  ;;  %547 = vrot.lane.b32.xlu0 %v544_v15, %s1845_s23  ;;  %s1852_s29 = smov [#allocation3]  }
  0x1a   : > { %v340_v10 = vcombine.high %v331_v8, %v331_v8  ;;  %s1782_s14 = sshll.u32 %s1852_s29, 4  ;;  %s1783_s14 = int_to_ptr.vmem [resolvable:$false] %s1782_s14 }
  0x1c   : > { %1647 = vmatprep.subr.msk.mxu0 %vm345_vm0, %v340_v10 }
  0x1d   : > { %1648 = vmatpush1.msk.msra.mxu0 %vm345_vm0, %v331_v8  ;;  %1204 = vrot.lane.b32.xlu1 %v540_v14, %s1846_s24 }
  0x1e   : > { %1649 = vmatmul.mubr.msk.f32.vlgmr.msra.gmra.mrb[0].mxu0 %vm341_vm1, %v332_v13  ;;  %1206 = vrot.lane.b32.xlu0 %v544_v15, %s1846_s24 }
  0x1f   : > { %1070 = vmatprep.mubr.f32.mxu0 %v1842_v0 }
  0x21   : > { %765 = vrot.lane.b32.xlu1 %v760_v12, %s1847_s25 }
  0x22   : > { %767 = vrot.lane.b32.xlu0 %v764_v11, %s1847_s25 }
  0x25   : > { %881 = vrot.lane.b32.xlu1 %v540_v14, %s1848_s26 }
  0x26   : > { %883 = vrot.lane.b32.xlu0 %v544_v15, %s1848_s26  ;;  %v1653_v15 = vld [vmem:[%s2218_s5 + $0x18] sm:$0xff] }
  0x29   : > { %1422 = vrot.lane.b32.xlu1 %v760_v12, %s1849_s27 }
  0x2a   : > { %1424 = vrot.lane.b32.xlu0 %v764_v11, %s1849_s27  ;;  %v1652_v11 = vld [vmem:[%s2218_s5 + $0x10] sm:$0xff] }
  0x2d   : > { %565 = vrot.lane.b32.xlu1 %v1842_v0, %s1850_s28 }
  0x87   : > { %v1093_v16 = vpop.permute.xlu1 %1092 }
  0x88   : > { %v1100_v17 = vmul.f32 0.0, %v1093_v16 }
  0x8a   : > { %1111 = vrot.lane.b32.xlu0 %v1100_v17, %s1848_s26 }
  0x8b   : > { %v546_v18 = vpop.permute.xlu1 %545 }
  0x8c   : > { %v554_v19 = vmul.f32 0.0, %v546_v18 }
  0x8e   : > { %v337_v20 = vpop.permute.xlu0 %336  ;;  %662 = vrot.lane.b32.xlu1 %v554_v19, %s1849_s27 }
  0x8f   : > { %v1205_v33 = vpop.permute.xlu1 %1204 }
  0x92   : > { %v1091_v21 = vpop.permute.xlu0 %1090 }
  0x93   : > { %v1094_v32 = vsel %vm905_vm3, %v1091_v21, %v1093_v16  ;;  %v766_v42 = vpop.permute.xlu1 %765 }
  0x94   : > { %v774_v51 = vmul.f32 0.0, %v766_v42 }
  0x96   : > { %v548_v22 = vpop.permute.xlu0 %547 }
  0x97   : > { %v550_v30 = vsel %vm549_vm2, %v546_v18, %v548_v22  ;;  %v882_v49 = vpop.permute.xlu1 %881 }
  0x98   : > { %v890_v61 = vmul.f32 0.0, %v882_v49 }
  0x9a   : > { %v1207_v23 = vpop.permute.xlu0 %1206 }
  0x9b   : > { %v1214_v24 = vmul.f32 0.0, %v1207_v23  ;;  %v1208_v36 = vsel %vm789_vm4, %v1205_v33, %v1207_v23  ;;  %v1423_v54 = vpop.permute.xlu1 %1422  ;;  %v1671_v23 = vld [vmem:[%s2218_s5 + $0x58] sm:$0xff] }
  0x9d   : > { %1225 = vrot.lane.b32.xlu0 %v1214_v24, %s1847_s25 }
  0x9e   : > { %v768_v43 = vpop.permute.xlu0 %767 }
  0x9f   : > { %v770_v45 = vsel %vm769_vm6, %v766_v42, %v768_v43  ;;  %v566_v4 = vpop.permute.xlu1 %565  ;;  %v1658_v42 = vld [vmem:[%s2218_s5 + $0x20] sm:$0xff] }
  0xa2   : > { %v884_v50 = vpop.permute.xlu0 %883 }
  0xa3   : > { %v886_v52 = vsel %vm885_vm7, %v882_v49, %v884_v50 }
  0xa6   : > { %v1425_v55 = vpop.permute.xlu0 %1424 }
  0xa7   : > { %v1432_v56 = vmul.f32 0.0, %v1425_v55  ;;  %v1426_v58 = vsel %vm668_vm8, %v1423_v54, %v1425_v55 }
  0xf1   : > { %v416_v25 = vpop.f32.mrb[0].mxu0 }
  0xf2   : > { %v417_v26 = vadd.f32 %v416_v25, %v337_v20  ;;  %v418_v27 = vpop.f32.mrb[1].mxu0  ;;  %v557_v25 = vld [vmem:[%s2218_s5] sm:$0xff] }
  0xf3   : > { %v419_v28 = vadd.f32 %v418_v27, %v337_v20  ;;  %v1670_v20 = vld [vmem:[%s2218_s5 + $0x50] sm:$0xff] }
  0xf4   : > { %v1989_v29 = vmax.f32 %v417_v26, 0.0 }
  0xf5   : > { %v422_v31 = vmax.f32 %v419_v28, 0.0 }
  0xf6   : > { %567 = vrot.lane.b32.xlu1 %v1989_v29, %s1850_s28  ;;  %v555_v35 = vmul.f32 %v550_v30, %v1989_v29  ;;  %v1098_v40 = vmul.f32 %v1091_v21, %v1989_v29  ;;  %v1212_v46 = vmul.f32 %v1205_v33, %v1989_v29  ;;  %v775_v47 = vmul.f32 %v770_v45, %v1989_v29 }
  0xf7   : > { %569 = vrot.lane.b32.xlu0 %v422_v31, %s1850_s28  ;;  %444 = vmatprep.subr.mxu1 %v422_v31  ;;  %v1099_v37 = vmul.f32 %v1094_v32, %v422_v31  ;;  %v1213_v38 = vmul.f32 %v1208_v36, %v422_v31  ;;  %v556_v48 = vmul.f32 %v548_v22, %v422_v31  ;;  %v558_v32 = vld [vmem:[%s2218_s5 + $0x8] sm:$0xff] }
  0xf8   : > { %1006 = vmatprep.subr.mxu0 %v422_v31  ;;  %445 = vmatpush1.msra.mxu1 %v1989_v29  ;;  %v776_v53 = vmul.f32 %v768_v43, %v422_v31  ;;  %v891_v57 = vmul.f32 %v886_v52, %v1989_v29  ;;  %v1431_v59 = vmul.f32 %v1426_v58, %v422_v31  ;;  %v1675_v36 = vld [vmem:[%s2218_s5 + $0x68] sm:$0xff]  ;;  %v1663_v58 = vld [vmem:[%s2218_s5 + $0x38] sm:$0xff] }
  0xf9   : > { %1007 = vmatpush1.msra.mxu0 %v1989_v29  ;;  %1650 = vmatmul.mubr.msk.f32.vlgmr.msra.gmra.mrb[0].mxu1 %vm437_vm5, %v423_v34  ;;  %v892_v60 = vmul.f32 %v884_v50, %v422_v31  ;;  %v1430_v62 = vmul.f32 %v1423_v54, %v1989_v29 }
  0xfa   : > { %664 = vrot.lane.b32.xlu1 %v555_v35, %s1849_s27  ;;  %514 = vmatprep.mubr.f32.mxu1 %v1842_v0 }
  0xfb   : > { %1107 = vrot.lane.b32.xlu0 %v1098_v40, %s1848_s26  ;;  %1668 = vmatmul.mubr.msk.f32.vlgmr.msra.gmra.mrb[2].mxu0 %vm437_vm5, %v1666_v39  ;;  %v1678_v40 = vld [vmem:[%s2218_s5 + $0x70] sm:$0xff] }
  0xfc   : > { %1076 = vmatprep.mubr.f32.mxu0 %v1842_v0  ;;  %v1112_v5 = vpop.permute.xlu0 %1111 }
  0xfd   : > { %1651 = vmatmul.mubr.msk.f32.gmra.mrb[2].mxu1 %vm437_vm5, %v424_v41 }
  0xfe   : > { %1109 = vrot.lane.b32.xlu1 %v1099_v37, %s1848_s26  ;;  %646 = vmatprep.mubr.f32.mxu1 %v1842_v0 }
  0xff   : > { %1221 = vrot.lane.b32.xlu0 %v1212_v46, %s1847_s25  ;;  %1669 = vmatmul.mubr.msk.f32.gmra.mrb[4].mxu0 %vm437_vm5, %v1667_v44  ;;  %v1679_v46 = vld [vmem:[%s2218_s5 + $0x78] sm:$0xff] }
 0x100   : > { %1187 = vmatprep.mubr.f32.mxu0 %v1842_v0  ;;  %v663_v6 = vpop.permute.xlu1 %662 }
 0x102   : > { %785 = vrot.lane.b32.xlu1 %v775_v47, %s1846_s24  ;;  %v1659_v47 = vld [vmem:[%s2218_s5 + $0x28] sm:$0xff] }
 0x103   : > { %666 = vrot.lane.b32.xlu0 %v556_v48, %s1849_s27 }
 0x106   : > { %1223 = vrot.lane.b32.xlu1 %v1213_v38, %s1847_s25 }
 0x107   : > { %1328 = vrot.lane.b32.xlu0 %v1842_v0, %s1851_s17 }
 0x10a   : > { %1326 = vrot.lane.b32.xlu1 %v422_v31, %s1851_s17  ;;  %v1674_v31 = vld [vmem:[%s2218_s5 + $0x60] sm:$0xff] }
 0x10b   : > { %1324 = vrot.lane.b32.xlu0 %v1989_v29, %s1851_s17  ;;  %s1692_s17 = sshll.u32 %s1925_s13, 10  ;;  %s2171_s13 = scalar_lea.sflag [#allocation4], %s323_s16 }
 0x10c   : > { %s2163_s27 = scalar_lea.hbm %s2222_s9, %s1692_s17 }
 0x10e   : > { %783 = vrot.lane.b32.xlu1 %v774_v51, %s1846_s24 }
 0x10f   : > { %787 = vrot.lane.b32.xlu0 %v776_v53, %s1846_s24  ;;  %v1226_v7 = vpop.permute.xlu0 %1225  ;;  %v1662_v53 = vld [vmem:[%s2218_s5 + $0x30] sm:$0xff] }
 0x112   : > { %901 = vrot.lane.b32.xlu1 %v891_v57, %s1844_s22 }
 0x113   : > { %1443 = vrot.lane.b32.xlu0 %v1432_v56, %s1845_s23  ;;  %v1682_v56 = vld [vmem:[%s2218_s5 + $0x80] sm:$0xff] }
 0x116   : > { %1441 = vrot.lane.b32.xlu1 %v1431_v59, %s1845_s23  ;;  %v1683_v59 = vld [vmem:[%s2218_s5 + $0x88] sm:$0xff] }
 0x117   : > { %903 = vrot.lane.b32.xlu0 %v892_v60, %s1844_s22 }
 0x11a   : > { %899 = vrot.lane.b32.xlu1 %v890_v61, %s1844_s22  ;;  %s1644_s22 = sshll.u32 %s323_s16, 6 }
 0x11b   : > { %1439 = vrot.lane.b32.xlu0 %v1430_v62, %s1845_s23  ;;  %s2150_s23 = scalar_lea.vmem [#allocation3], %s1644_s22  ;;  %s1784_s22 = scalar_lea.vmem %s1783_s14, 2048 }
 0x11c   : > { %s1578_s24 = sshll.u32 %s2150_s23, 4  ;;  %s2165_s24 = int_to_ptr.vmem [resolvable:$true] %s1578_s24 }
 0x11d   : > { %s1778_s21 = scalar_lea.vmem %s2165_s24, 1024  ;;  %p1785_p0 = scmp.lt.s32.totalorder %s2165_s24, %s1783_s14 }
 0x11e   : > { %429 = vperm.xlu1 %1776, %v425_v2   ;;  %p1779_p11 = scmp.ne.s32.totalorder %s2165_s24, %s1778_s21  ;;  %p1786_p1 = scmp.lt.s32.totalorder %s1784_s22, %s1778_s21 }
 0x11f   : > { %434 = vperm.xlu0 %1775, %v426_v63  }
 0x120   : > { %p1780_p12 = pnand %p1779_p11, %p1942_p5  ;;  %p1787_p2 = por %p1786_p1, %p1785_p0 }
 0x122   : > { %1540 = vperm.xlu1 %1776, %v1536_v3   ;;  %p1781_p13 = pneg %p1780_p12 }
 0x123   : > { %1545 = vperm.xlu0 %1775, %v1537_v1  }
 0x124   : > { %p1788_p3 = pnand %p1787_p2, %p1781_p13 }
 0x168   : > { %v568_v8 = vpop.permute.xlu1 %567 }
 0x169   : > { %v570_v9 = vpop.permute.xlu0 %569  ;;  %v572_v12 = vsel %vm571_vm9, %v566_v4, %v568_v8 }
 0x16a   : > { %v573_v10 = vsel %vm571_vm9, %v568_v8, %v570_v9 }
 0x16b   : > { %582 = vmatprep.subr.mxu1 %v573_v10 }
 0x16c   : > { %v665_v13 = vpop.permute.xlu1 %664  ;;  %583 = vmatpush1.msra.mxu1 %v572_v12 }
 0x16d   : > { %v1108_v14 = vpop.permute.xlu0 %1107  ;;  %1654 = vmatmul.mubr.msk.f32.vlgmr.msra.gmra.mrb[4].mxu1 %vm437_vm5, %v1652_v11  ;;  %v669_v26 = vsel %vm668_vm8, %v663_v6, %v665_v13 }
 0x16e   : > { %652 = vmatprep.mubr.f32.mxu1 %v1842_v0 }
 0x170   : > { %v1110_v16 = vpop.permute.xlu1 %1109 }
 0x171   : > { %v1113_v17 = vsel %vm885_vm7, %v1108_v14, %v1110_v16  ;;  %v1222_v18 = vpop.permute.xlu0 %1221  ;;  %v1114_v19 = vsel %vm885_vm7, %v1110_v16, %v1112_v5  ;;  %1655 = vmatmul.mubr.msk.f32.gmra.mrb[6].mxu1 %vm437_vm5, %v1653_v15 }
 0x172   : > { %1123 = vmatprep.subr.mxu0 %v1114_v19  ;;  %743 = vmatprep.mubr.f32.mxu1 %v1842_v0 }
 0x173   : > { %1124 = vmatpush1.msra.mxu0 %v1113_v17 }
 0x174   : > { %v786_v21 = vpop.permute.xlu1 %785  ;;  %1672 = vmatmul.mubr.msk.f32.vlgmr.msra.gmra.mrb[2].mxu0 %vm437_vm5, %v1670_v20 }
 0x175   : > { %v667_v22 = vpop.permute.xlu0 %666  ;;  %1193 = vmatprep.mubr.f32.mxu0 %v1842_v0 }
 0x176   : > { %v670_v24 = vsel %vm668_vm8, %v665_v13, %v667_v22 }
 0x177   : > { %679 = vmatprep.subr.mxu1 %v670_v24 }
 0x178   : > { %v1224_v27 = vpop.permute.xlu1 %1223  ;;  %680 = vmatpush1.msra.mxu1 %v669_v26  ;;  %1673 = vmatmul.mubr.msk.f32.gmra.mrb[4].mxu0 %vm437_vm5, %v1671_v23 }
 0x179   : > { %v1227_v28 = vsel %vm769_vm6, %v1222_v18, %v1224_v27  ;;  %v1329_v29 = vpop.permute.xlu0 %1328  ;;  %v1228_v30 = vsel %vm769_vm6, %v1224_v27, %v1226_v7  ;;  %1301 = vmatprep.mubr.f32.mxu0 %v1842_v0  ;;  %1656 = vmatmul.mubr.msk.f32.vlgmr.msra.gmra.mrb[4].mxu1 %vm437_vm5, %v557_v25 }
 0x17a   : > { %1237 = vmatprep.subr.mxu0 %v1228_v30  ;;  %749 = vmatprep.mubr.f32.mxu1 %v1842_v0 }
 0x17b   : > { %1238 = vmatpush1.msra.mxu0 %v1227_v28 }
 0x17c   : > { %v1327_v33 = vpop.permute.xlu1 %1326  ;;  %1676 = vmatmul.mubr.msk.f32.vlgmr.msra.gmra.mrb[2].mxu0 %vm437_vm5, %v1674_v31 }
 0x17d   : > { %v1325_v34 = vpop.permute.xlu0 %1324  ;;  %v1332_v35 = vsel %vm1330_vm10, %v1327_v33, %v1329_v29  ;;  %1657 = vmatmul.mubr.msk.f32.gmra.mrb[6].mxu1 %vm437_vm5, %v558_v32  ;;  %1307 = vmatprep.mubr.f32.mxu0 %v1842_v0 }
 0x17e   : > { %v1331_v37 = vsel %vm1330_vm10, %v1325_v34, %v1327_v33  ;;  %1341 = vmatprep.subr.mxu0 %v1332_v35  ;;  %864 = vmatprep.mubr.f32.mxu1 %v1842_v0 }
 0x17f   : > { %1342 = vmatpush1.msra.mxu0 %v1331_v37 }
 0x180   : > { %v784_v38 = vpop.permute.xlu1 %783  ;;  %1677 = vmatmul.mubr.msk.f32.gmra.mrb[4].mxu0 %vm437_vm5, %v1675_v36 }
 0x181   : > { %v788_v39 = vpop.permute.xlu0 %787  ;;  %1405 = vmatprep.mubr.f32.mxu0 %v1842_v0  ;;  %v790_v43 = vsel %vm789_vm4, %v784_v38, %v786_v21 }
 0x182   : > { %v791_v41 = vsel %vm789_vm4, %v786_v21, %v788_v39 }
 0x183   : > { %800 = vmatprep.subr.mxu1 %v791_v41 }
 0x184   : > { %v902_v44 = vpop.permute.xlu1 %901  ;;  %801 = vmatpush1.msra.mxu1 %v790_v43  ;;  %1680 = vmatmul.mubr.msk.f32.vlgmr.msra.gmra.mrb[2].mxu0 %vm437_vm5, %v1678_v40 }
 0x185   : > { %v1444_v45 = vpop.permute.xlu0 %1443  ;;  %1660 = vmatmul.mubr.msk.f32.vlgmr.msra.gmra.mrb[4].mxu1 %vm437_vm5, %v1658_v42  ;;  %1411 = vmatprep.mubr.f32.mxu0 %v1842_v0 }
 0x186   : > { %870 = vmatprep.mubr.f32.mxu1 %v1842_v0 }
 0x188   : > { %v1442_v48 = vpop.permute.xlu1 %1441  ;;  %1681 = vmatmul.mubr.msk.f32.gmra.mrb[4].mxu0 %vm437_vm5, %v1679_v46 }
 0x189   : > { %v904_v49 = vpop.permute.xlu0 %903  ;;  %v1446_v50 = vsel %vm549_vm2, %v1442_v48, %v1444_v45  ;;  %1661 = vmatmul.mubr.msk.f32.gmra.mrb[6].mxu1 %vm437_vm5, %v1659_v47  ;;  %1519 = vmatprep.mubr.f32.mxu0 %v1842_v0 }
 0x18a   : > { %1455 = vmatprep.subr.mxu0 %v1446_v50  ;;  %v907_v51 = vsel %vm905_vm3, %v902_v44, %v904_v49  ;;  %980 = vmatprep.mubr.f32.mxu1 %v1842_v0 }
 0x18b   : > { %916 = vmatprep.subr.mxu1 %v907_v51 }
 0x18c   : > { %v900_v52 = vpop.permute.xlu1 %899 }
 0x18d   : > { %v906_v54 = vsel %vm905_vm3, %v900_v52, %v902_v44  ;;  %v1440_v55 = vpop.permute.xlu0 %1439 }
 0x18e   : > { %v1445_v57 = vsel %vm549_vm2, %v1440_v55, %v1442_v48  ;;  %917 = vmatpush1.msra.mxu1 %v906_v54 }
 0x18f   : > { %1664 = vmatmul.mubr.msk.f32.vlgmr.msra.gmra.mrb[4].mxu1 %vm437_vm5, %v1662_v53  ;;  %1456 = vmatpush1.msra.mxu0 %v1445_v57 }
 0x190   : > { %1684 = vmatmul.mubr.msk.f32.vlgmr.msra.gmra.mrb[2].mxu0 %vm437_vm5, %v1682_v56  ;;  %986 = vmatprep.mubr.f32.mxu1 %v1842_v0 }
 0x191   : > { %1525 = vmatprep.mubr.f32.mxu0 %v1842_v0 }
 0x193   : > { %1665 = vmatmul.mubr.msk.f32.gmra.mrb[6].mxu1 %vm437_vm5, %v1663_v58 }
 0x194   : > { %1685 = vmatmul.mubr.msk.f32.gmra.mrb[4].mxu0 %vm437_vm5, %v1683_v59 }
 0x19d   : > { %v430_v60 = vpop.permute.xlu1 %429 }
 0x19e   : > { %v435_v3 = vpop.permute.xlu0 %434 }
 0x1a1   : > { %v1541_v11 = vpop.permute.xlu1 %1540 }
 0x1a2   : > { %v1546_v25 = vpop.permute.xlu0 %1545 }
 0x1cc   : > { %v510_v61 = vpop.f32.mrb[0].mxu1 }
 0x1cd   : > { %v512_v62 = vpop.f32.mrb[1].mxu1  ;;  %v511_v63 = vadd.f32 %v510_v61, %v430_v60 }
 0x1ce   : > { %v513_v1 = vadd.f32 %v512_v62, %v430_v60 }
 0x1cf   : > { %v521_v2 = vmax.f32 %v511_v63, 0.0 }
 0x1d0   : > { %v516_v4 = vpop.f32.mrb[2].mxu1  ;;  %v522_v0 = vmax.f32 %v513_v1, 0.0 }
 0x1d1   : > { %v517_v5 = vadd.f32 %v516_v4, %v435_v3  ;;  %v518_v6 = vpop.f32.mrb[3].mxu1  ;;  %1556 = vst [vmem:[%s2150_s23] sm:$0xff] %v521_v2 }
 0x1d2   : > { %v519_v7 = vadd.f32 %v518_v6, %v435_v3  ;;  %1557 = vst [vmem:[%s2150_s23 + $0x8] sm:$0xff] %v522_v0 }
 0x1d3   : > { %v523_v8 = vmax.f32 %v517_v5, 0.0 }
 0x1d4   : > { %v524_v9 = vmax.f32 %v519_v7, 0.0 }
 0x1d5   : > { %1558 = vst [vmem:[%s2150_s23 + $0x10] sm:$0xff] %v523_v8 }
 0x1d6   : > { %1559 = vst [vmem:[%s2150_s23 + $0x18] sm:$0xff] %v524_v9 }
 0x262   : > { %v982_v10 = vpop.f32.mrb[4].mxu1 }
 0x263   : > { %v984_v12 = vpop.f32.mrb[5].mxu1  ;;  %v1521_v13 = vpop.f32.mrb[2].mxu0 }
 0x264   : > { %v1693_v14 = vadd.f32 %v1521_v13, %v982_v10  ;;  %v1523_v15 = vpop.f32.mrb[3].mxu0 }
 0x265   : > { %v1694_v16 = vadd.f32 %v1523_v15, %v984_v12 }
 0x266   : > { %v1548_v17 = vadd.f32 %v1693_v14, %v1541_v11  ;;  %v988_v18 = vpop.f32.mrb[6].mxu1 }
 0x267   : > { %v1549_v19 = vadd.f32 %v1694_v16, %v1541_v11  ;;  %v990_v20 = vpop.f32.mrb[7].mxu1  ;;  %v1527_v21 = vpop.f32.mrb[4].mxu0 }
 0x268   : > { %v1552_v22 = vmax.f32 %v1548_v17, 0.0  ;;  %v1695_v23 = vadd.f32 %v1527_v21, %v988_v18  ;;  %v1529_v24 = vpop.f32.mrb[5].mxu0 }
 0x269   : > { %v1553_v26 = vmax.f32 %v1549_v19, 0.0  ;;  %v1696_v27 = vadd.f32 %v1529_v24, %v990_v20 }
 0x26a   : > { %1560 = vst [vmem:[%s2150_s23 + $0x20] sm:$0xff] %v1552_v22  ;;  %v1550_v28 = vadd.f32 %v1695_v23, %v1546_v25 }
 0x26b   : > { %1561 = vst [vmem:[%s2150_s23 + $0x28] sm:$0xff] %v1553_v26  ;;  %v1551_v29 = vadd.f32 %v1696_v27, %v1546_v25 }
 0x26c   : > { %v1554_v30 = vmax.f32 %v1550_v28, 0.0 }
 0x26d   : > { %v1555_v31 = vmax.f32 %v1551_v29, 0.0 }
 0x26e   : > { %1562 = vst [vmem:[%s2150_s23 + $0x30] sm:$0xff] %v1554_v30 }
 0x26f   : > { %1563 = vst [vmem:[%s2150_s23 + $0x38] sm:$0xff] %v1555_v31 }
 0x270   : > { %1791 = shalt.err (!%p1788_p3)
}
 0x271   : > { %s1792_s16 = scalar_lea.hbm %s2163_s27, 1024  ;;  %s1796_s25 = scalar_lea.hbm %s2222_s9, 2048 }
 0x272   : > { %p1793_p4 = scmp.ne.s32.totalorder %s2163_s27, %s1792_s16  ;;  %p1797_p9 = scmp.lt.u32.totalorder %s2163_s27, %s2222_s9 }
 0x273   : > { %p1798_p10 = scmp.lt.u32.totalorder %s1796_s25, %s1792_s16  ;;  %p1800_p12 = scmp.lt.u32.totalorder %s1792_s16, %s2163_s27 }
 0x274   : > { %p1794_p7 = pnand %p1793_p4, %p1942_p5 }
 0x275   : > { %p1799_p11 = por %p1798_p10, %p1797_p9 }
 0x276   : > { %p1795_p8 = pneg %p1794_p7 }
 0x277   : > { %p1801_p13 = por %p1800_p12, %p1799_p11 }
 0x279   : > { %p1802_p0 = pnand %p1801_p13, %p1795_p8 }
 0x27b   : > { %1805 = shalt.err (!%p1802_p0)
}
 0x27c   : > { %s1853_s21 = smov 256  }
 0x27d   : > { %1725 = dma.vmem_to_hbm [thread:$0]  (%p1942_p5), %s2165_s24, 1024, %s2163_s27, %s2171_s13, %s1853_s21, %s1853_s21, %s1850_s28  }
 0x27e PF: > { %p1731_p1 = scmp.ge.s32.totalorder %s1840_s12, 2  ;;  %s1593_s14 = sand.u32 1, %s1828_s30  }
 0x27f   : > { %s1594_s22 = scalar_lea.sflag [#allocation4], %s1593_s14 }
 0x280   : > { %p1728_p2 = pnand %p1731_p1, %p1946_p6 }
 0x282   : > { %1823 = dma.done.wait (!%p1728_p2), %s1594_s22, 1024  }
 0x283   : > { %1825 = vsyncadd (!%p1728_p2), %s1594_s22, 4294966272  ;;  %p19_p3 = scmp.ge.s32.totalorder %s1929_s15, 4   ;;  %s2225_s30 = smov %s1832_s10 }
 0x284   : > { %s2226_s10 = smov %s1836_s11  ;;  %s2227_s11 = smov %s1940_s18 }
 0x285   : > { %s2228_s12 = smov %s1929_s15  ;;  %21 = sbr.rel (!%p19_p3) target bundleno = 3 (0x3), region = 99 }
 0x28c   :  { %1599 = vsyncpa [#allocation4], 1 }
 0x28d   :  { %1601 = vsyncpa [#allocation4 + $0x1], 1 }

</bundles_post_ra>
